<compile_context>
chip_gen: v5e
topology: v5e:2x2
jax: 0.10.0
libtpu: 0.0.40
codegen_flags: <defaults>
</compile_context>

<pallas_src>
import math

import jax
import jax.numpy as jnp
from jax.experimental import pallas as pl
from jax.experimental.pallas import tpu as pltpu

# ----- model hyper-parameters (small, consistent with the module) -----------
BATCH = 2
SEQ = 8
HIDDEN = 32
NUM_HEADS = 4
HEAD_DIM = HIDDEN // NUM_HEADS
LN_EPS = 1e-12
SCALE = math.sqrt(HEAD_DIM)
INV_H = 1.0 / HIDDEN


def _mha_kernel(x_ref, mask_ref, wqkv_ref, bqkv_ref, wo_ref, bo_ref,
                gamma_ref, beta_ref, out_ref):
    """MHA forward for ONE batch element (grid axis = batch, 'parallel')."""
    S, H = SEQ, HIDDEN
    NH, HD = NUM_HEADS, HEAD_DIM

    x = x_ref[...].reshape(S, H)                  # (S, H)  f32
    mask = mask_ref[...].reshape(1, S)            # (1, S)  additive mask, f32

    # --- fused QKV projection: one lane-dense 2-D matmul, bf16 on the MXU ---
    # (1/sqrt(HD) is already folded into the Q columns / bias.)
    qkv = jnp.dot(x.astype(jnp.bfloat16), wqkv_ref[...],
                  preferred_element_type=jnp.float32) + bqkv_ref[...]   # (S, 3H) f32

    # [Q_allheads | K_allheads | V_allheads] packing -> slices at 0 / H / 2H.
    q = qkv[:, 0:H]
    k = qkv[:, H:2 * H]
    v = qkv[:, 2 * H:3 * H]

    # Head split: HD-aligned lane slices stacked on a new leading axis
    # (free at production HEAD_DIM; only transpose-free route from a 2-D matmul).
    def split_heads(t):                            # (S, H) -> (NH, S, HD)
        return jnp.stack([t[:, h * HD:(h + 1) * HD] for h in range(NH)], axis=0)

    qh = split_heads(q).astype(jnp.bfloat16)
    kh = split_heads(k).astype(jnp.bfloat16)
    vh = split_heads(v).astype(jnp.bfloat16)

    # --- scaled-dot-product attention, heads batched on the leading axis ----
    scores = jnp.einsum('hqd,hkd->hqk', qh, kh,
                        preferred_element_type=jnp.float32)             # (NH, S, S) f32
    # Additive mask broadcast implicitly over heads and query positions.
    scores = scores + mask

    # numerically-stable softmax in f32; divide moved to the EUP (approx recip).
    scores = scores - jnp.max(scores, axis=-1, keepdims=True)
    probs = jnp.exp(scores)
    probs = probs * pl.reciprocal(jnp.sum(probs, axis=-1, keepdims=True),
                                  approx=True)
    # attn_dropout: identity (eval mode).

    ctx = jnp.einsum('hqk,hkd->hqd', probs.astype(jnp.bfloat16), vh,
                     preferred_element_type=jnp.float32)                # (NH, S, HD) f32

    # --- output dense: per-head matmul; head reduction fused into one sum ---
    hid = jnp.einsum('hqd,hdo->hqo', ctx.astype(jnp.bfloat16), wo_ref[...],
                     preferred_element_type=jnp.float32)                # (NH, S, H) f32
    hidden = jnp.sum(hid, axis=0) + bo_ref[...]                         # (S, H)
    # out_dropout: identity (eval mode).

    y = hidden + x                                                       # residual, f32

    # --- LayerNorm (biased variance, eps inside rsqrt) == torch.nn.LayerNorm ---
    mean = jnp.sum(y, axis=-1, keepdims=True) * INV_H
    yc = y - mean
    var = jnp.sum(yc * yc, axis=-1, keepdims=True) * INV_H
    out = yc * jax.lax.rsqrt(var + LN_EPS) * gamma_ref[...] + beta_ref[...]

    out_ref[...] = out.reshape(1, S, H)


def _prepare_params(params):
    """One-time repack of standard (in,out) Linear params into the kernel layout."""
    H, NH, HD = HIDDEN, NUM_HEADS, HEAD_DIM
    inv_scale = 1.0 / SCALE
    wq = params["wq"] * inv_scale          # fold softmax scale into the Q projection
    bq = params["bq"] * inv_scale

    # Fused QKV weight/bias, packed [Q_allheads | K_allheads | V_allheads];
    # inside each block the columns keep the head-major BERT ordering.
    wqkv = jnp.concatenate([wq, params["wk"], params["wv"]], axis=-1)    # (H, 3H)
    bqkv = jnp.concatenate([bq, params["bk"], params["bv"]], axis=-1)    # (1, 3H)
    # Output dense weight split by per-head input rows: (H, H) -> (NH, HD, H).
    wo = params["wo"].reshape(NH, HD, H)

    return dict(wqkv=wqkv.astype(jnp.bfloat16),   # MXU operands in bf16
                bqkv=bqkv,                        # biases / LN params stay f32
                wo=wo.astype(jnp.bfloat16),
                bo=params["bo"],
                gamma=params["gamma"], beta=params["beta"])


def multi_head_attention(x, attention_mask, params):
    """x: (B, S, H) f32; attention_mask: (B, 1, S) f32 additive mask."""
    B, S, H = x.shape
    NH, HD = NUM_HEADS, HEAD_DIM
    prep = _prepare_params(params)

    return pl.pallas_call(
        _mha_kernel,
        out_shape=jax.ShapeDtypeStruct((B, S, H), jnp.float32),
        grid_spec=pltpu.PrefetchScalarGridSpec(
            num_scalar_prefetch=0,
            grid=(B,),                               # one independent step per batch
            in_specs=[
                pl.BlockSpec((1, S, H), lambda b: (b, 0, 0)),     # x (per batch)
                pl.BlockSpec((1, 1, S), lambda b: (b, 0, 0)),     # additive mask
                pl.BlockSpec((H, 3 * H), lambda b: (0, 0)),       # fused QKV weight (bf16)
                pl.BlockSpec((1, 3 * H), lambda b: (0, 0)),       # fused QKV bias (f32)
                pl.BlockSpec((NH, HD, H), lambda b: (0, 0, 0)),   # dense weight, per-head rows (bf16)
                pl.BlockSpec((1, H), lambda b: (0, 0)),           # dense bias
                pl.BlockSpec((1, H), lambda b: (0, 0)),           # LayerNorm gamma
                pl.BlockSpec((1, H), lambda b: (0, 0)),           # LayerNorm beta
            ],
            out_specs=pl.BlockSpec((1, S, H), lambda b: (b, 0, 0)),
        ),
        # "parallel" batch axis: shards across both TensorCores on v7x,
        # no cost on single-TC v5e/v6e.
        compiler_params=pltpu.CompilerParams(
            dimension_semantics=("parallel",)),
    )(x, attention_mask, prep["wqkv"], prep["bqkv"], prep["wo"], prep["bo"],
      prep["gamma"], prep["beta"])


def _init_params(key):
    """Deterministic synthetic parameters. Weights stored as (in, out)."""
    ks = jax.random.split(key, 8)
    bound = 1.0 / math.sqrt(HIDDEN)

    def lin(kw, kb):
        w = jax.random.uniform(kw, (HIDDEN, HIDDEN), jnp.float32, -bound, bound)
        b = jax.random.uniform(kb, (1, HIDDEN), jnp.float32, -bound, bound)
        return w, b

    wq, bq = lin(ks[0], ks[1])
    wk, bk = lin(ks[2], ks[3])
    wv, bv = lin(ks[4], ks[5])
    wo, bo = lin(ks[6], ks[7])
    return dict(
        wq=wq, bq=bq, wk=wk, bk=bk, wv=wv, bv=bv, wo=wo, bo=bo,
        gamma=jnp.ones((1, HIDDEN), jnp.float32),
        beta=jnp.zeros((1, HIDDEN), jnp.float32),
    )


if __name__ == "__main__":
    key = jax.random.PRNGKey(0)
    k_x, k_m, k_p = jax.random.split(key, 3)

    x = jax.random.normal(k_x, (BATCH, SEQ, HIDDEN), jnp.float32)
    # additive attention mask: 0 for attend, -10000 for masked (BERT convention),
    # kept in its compact (B, 1, S) form and broadcast inside the kernel.
    keep = (jax.random.uniform(k_m, (BATCH, 1, SEQ)) > 0.2).astype(jnp.float32)
    attention_mask = (1.0 - keep) * -10000.0

    params = _init_params(k_p)

    out = multi_head_attention(x, attention_mask, params)
    jax.block_until_ready(out)

    # TODO(synk): dropout layers are treated as eval-mode identity (no RNG mask);
    # bf16 MXU operands + approx softmax reciprocal trade ~1e-3 rel. accuracy for speed.
    assert out.shape == (BATCH, SEQ, HIDDEN)
    print("KERNEL_OK")
</pallas_src>

<mosaic_0001>
module attributes {stable_mosaic.version = 11 : i64} {
  func.func @_mha_kernel(%arg0: i32, %arg1: memref<1x8x32xf32, #tpu.memory_space<vmem>>, %arg2: memref<1x1x8xf32, #tpu.memory_space<vmem>>, %arg3: memref<32x96xbf16, #tpu.memory_space<vmem>>, %arg4: memref<1x96xf32, #tpu.memory_space<vmem>>, %arg5: memref<4x8x32xbf16, #tpu.memory_space<vmem>>, %arg6: memref<1x32xf32, #tpu.memory_space<vmem>>, %arg7: memref<1x32xf32, #tpu.memory_space<vmem>>, %arg8: memref<1x32xf32, #tpu.memory_space<vmem>>, %arg9: memref<1x8x32xf32, #tpu.memory_space<vmem>>) attributes {dimension_semantics = [#tpu.dimension_semantics<parallel>], iteration_bounds = array<i64: 2>, scalar_prefetch = 0 : i64, scratch_operands = 0 : i64, tpu.core_type = #tpu.core_type<tc>, window_params = [{transform_indices = @transform_0, window_bounds = array<i64: 1, 8, 32>}, {transform_indices = @transform_1, window_bounds = array<i64: 1, 1, 8>}, {pipeline_mode = #tpu.pipeline_mode<synchronous>, transform_indices = @transform_2, window_bounds = array<i64: 32, 96>}, {pipeline_mode = #tpu.pipeline_mode<synchronous>, transform_indices = @transform_3, window_bounds = array<i64: 1, 96>}, {pipeline_mode = #tpu.pipeline_mode<synchronous>, transform_indices = @transform_4, window_bounds = array<i64: 4, 8, 32>}, {pipeline_mode = #tpu.pipeline_mode<synchronous>, transform_indices = @transform_5, window_bounds = array<i64: 1, 32>}, {pipeline_mode = #tpu.pipeline_mode<synchronous>, transform_indices = @transform_6, window_bounds = array<i64: 1, 32>}, {pipeline_mode = #tpu.pipeline_mode<synchronous>, transform_indices = @transform_7, window_bounds = array<i64: 1, 32>}, {transform_indices = @transform_8, window_bounds = array<i64: 1, 8, 32>}]} {
    %c0 = arith.constant 0 : index
    %c0_0 = arith.constant 0 : index
    %c0_1 = arith.constant 0 : index
    %0 = vector.load %arg1[%c0, %c0_0, %c0_1] : memref<1x8x32xf32, #tpu.memory_space<vmem>>, vector<1x8x32xf32>
    %1 = vector.shape_cast %0 : vector<1x8x32xf32> to vector<8x32xf32>
    %c0_2 = arith.constant 0 : index
    %c0_3 = arith.constant 0 : index
    %c0_4 = arith.constant 0 : index
    %2 = vector.load %arg2[%c0_2, %c0_3, %c0_4] : memref<1x1x8xf32, #tpu.memory_space<vmem>>, vector<1x1x8xf32>
    %3 = vector.shape_cast %2 : vector<1x1x8xf32> to vector<1x8xf32>
    %4 = arith.truncf %1 : vector<8x32xf32> to vector<8x32xbf16>
    %c0_5 = arith.constant 0 : index
    %c0_6 = arith.constant 0 : index
    %5 = vector.load %arg3[%c0_5, %c0_6] : memref<32x96xbf16, #tpu.memory_space<vmem>>, vector<32x96xbf16>
    %cst = arith.constant dense<0.000000e+00> : vector<8x96xf32>
    %6 = tpu.matmul %4, %5, %cst {dimension_numbers = #tpu.dot_dimension_numbers<[1], [0], [0], [1], [0, 0, 1, 1], [], []>} : vector<8x32xbf16>, vector<32x96xbf16>, vector<8x96xf32> -> vector<8x96xf32>
    %c0_7 = arith.constant 0 : index
    %c0_8 = arith.constant 0 : index
    %7 = vector.load %arg4[%c0_7, %c0_8] : memref<1x96xf32, #tpu.memory_space<vmem>>, vector<1x96xf32>
    %8 = vector.broadcast %7 : vector<1x96xf32> to vector<8x96xf32>
    %9 = arith.addf %6, %8 : vector<8x96xf32>
    %10 = vector.extract_strided_slice %9 {offsets = [0, 0], sizes = [8, 32], strides = [1, 1]} : vector<8x96xf32> to vector<8x32xf32>
    %11 = vector.extract_strided_slice %9 {offsets = [0, 32], sizes = [8, 32], strides = [1, 1]} : vector<8x96xf32> to vector<8x32xf32>
    %12 = vector.extract_strided_slice %9 {offsets = [0, 64], sizes = [8, 32], strides = [1, 1]} : vector<8x96xf32> to vector<8x32xf32>
    %13 = vector.extract_strided_slice %10 {offsets = [0, 0], sizes = [8, 8], strides = [1, 1]} : vector<8x32xf32> to vector<8x8xf32>
    %14 = vector.extract_strided_slice %10 {offsets = [0, 8], sizes = [8, 8], strides = [1, 1]} : vector<8x32xf32> to vector<8x8xf32>
    %15 = vector.extract_strided_slice %10 {offsets = [0, 16], sizes = [8, 8], strides = [1, 1]} : vector<8x32xf32> to vector<8x8xf32>
    %16 = vector.extract_strided_slice %10 {offsets = [0, 24], sizes = [8, 8], strides = [1, 1]} : vector<8x32xf32> to vector<8x8xf32>
    %17 = vector.shape_cast %13 : vector<8x8xf32> to vector<1x8x8xf32>
    %18 = vector.shape_cast %14 : vector<8x8xf32> to vector<1x8x8xf32>
    %19 = vector.shape_cast %15 : vector<8x8xf32> to vector<1x8x8xf32>
    %20 = vector.shape_cast %16 : vector<8x8xf32> to vector<1x8x8xf32>
    %21 = tpu.concatenate %17, %18, %19, %20 in 0 : vector<1x8x8xf32>, vector<1x8x8xf32>, vector<1x8x8xf32>, vector<1x8x8xf32> -> vector<4x8x8xf32>
    %22 = arith.truncf %21 : vector<4x8x8xf32> to vector<4x8x8xbf16>
    %23 = vector.extract_strided_slice %11 {offsets = [0, 0], sizes = [8, 8], strides = [1, 1]} : vector<8x32xf32> to vector<8x8xf32>
    %24 = vector.extract_strided_slice %11 {offsets = [0, 8], sizes = [8, 8], strides = [1, 1]} : vector<8x32xf32> to vector<8x8xf32>
    %25 = vector.extract_strided_slice %11 {offsets = [0, 16], sizes = [8, 8], strides = [1, 1]} : vector<8x32xf32> to vector<8x8xf32>
    %26 = vector.extract_strided_slice %11 {offsets = [0, 24], sizes = [8, 8], strides = [1, 1]} : vector<8x32xf32> to vector<8x8xf32>
    %27 = vector.shape_cast %23 : vector<8x8xf32> to vector<1x8x8xf32>
    %28 = vector.shape_cast %24 : vector<8x8xf32> to vector<1x8x8xf32>
    %29 = vector.shape_cast %25 : vector<8x8xf32> to vector<1x8x8xf32>
    %30 = vector.shape_cast %26 : vector<8x8xf32> to vector<1x8x8xf32>
    %31 = tpu.concatenate %27, %28, %29, %30 in 0 : vector<1x8x8xf32>, vector<1x8x8xf32>, vector<1x8x8xf32>, vector<1x8x8xf32> -> vector<4x8x8xf32>
    %32 = arith.truncf %31 : vector<4x8x8xf32> to vector<4x8x8xbf16>
    %33 = vector.extract_strided_slice %12 {offsets = [0, 0], sizes = [8, 8], strides = [1, 1]} : vector<8x32xf32> to vector<8x8xf32>
    %34 = vector.extract_strided_slice %12 {offsets = [0, 8], sizes = [8, 8], strides = [1, 1]} : vector<8x32xf32> to vector<8x8xf32>
    %35 = vector.extract_strided_slice %12 {offsets = [0, 16], sizes = [8, 8], strides = [1, 1]} : vector<8x32xf32> to vector<8x8xf32>
    %36 = vector.extract_strided_slice %12 {offsets = [0, 24], sizes = [8, 8], strides = [1, 1]} : vector<8x32xf32> to vector<8x8xf32>
    %37 = vector.shape_cast %33 : vector<8x8xf32> to vector<1x8x8xf32>
    %38 = vector.shape_cast %34 : vector<8x8xf32> to vector<1x8x8xf32>
    %39 = vector.shape_cast %35 : vector<8x8xf32> to vector<1x8x8xf32>
    %40 = vector.shape_cast %36 : vector<8x8xf32> to vector<1x8x8xf32>
    %41 = tpu.concatenate %37, %38, %39, %40 in 0 : vector<1x8x8xf32>, vector<1x8x8xf32>, vector<1x8x8xf32>, vector<1x8x8xf32> -> vector<4x8x8xf32>
    %42 = arith.truncf %41 : vector<4x8x8xf32> to vector<4x8x8xbf16>
    "tpu.trace_start"() <{level = 10 : i32, message = "hqd,hkd->hqk"}> : () -> ()
    %cst_9 = arith.constant dense<0.000000e+00> : vector<4x8x8xf32>
    %43 = tpu.matmul %22, %32, %cst_9 {dimension_numbers = #tpu.dot_dimension_numbers<[2], [2], [1], [1], [0, 0, 0, 1, 1, 1], [0], [0]>} : vector<4x8x8xbf16>, vector<4x8x8xbf16>, vector<4x8x8xf32> -> vector<4x8x8xf32>
    "tpu.trace_stop"() : () -> ()
    %44 = vector.shape_cast %3 : vector<1x8xf32> to vector<1x1x8xf32>
    %45 = vector.broadcast %44 : vector<1x1x8xf32> to vector<4x8x8xf32>
    %46 = arith.addf %43, %45 : vector<4x8x8xf32>
    %cst_10 = arith.constant dense<0xFF800000> : vector<4x8xf32>
    %47 = vector.multi_reduction <maximumf>, %46, %cst_10 [2] : vector<4x8x8xf32> to vector<4x8xf32>
    %48 = vector.shape_cast %47 : vector<4x8xf32> to vector<4x8x1xf32>
    %49 = vector.broadcast %48 : vector<4x8x1xf32> to vector<4x8x8xf32>
    %50 = arith.subf %46, %49 : vector<4x8x8xf32>
    %51 = math.exp %50 : vector<4x8x8xf32>
    %cst_11 = arith.constant dense<0.000000e+00> : vector<4x8xf32>
    %52 = vector.multi_reduction <add>, %51, %cst_11 [2] : vector<4x8x8xf32> to vector<4x8xf32>
    %53 = vector.shape_cast %52 : vector<4x8xf32> to vector<4x8x1xf32>
    %54 = tpu.reciprocal %53 {approx = true} : vector<4x8x1xf32> -> vector<4x8x1xf32>
    %55 = vector.broadcast %54 : vector<4x8x1xf32> to vector<4x8x8xf32>
    %56 = arith.mulf %51, %55 : vector<4x8x8xf32>
    %57 = arith.truncf %56 : vector<4x8x8xf32> to vector<4x8x8xbf16>
    "tpu.trace_start"() <{level = 10 : i32, message = "hqk,hkd->hqd"}> : () -> ()
    %cst_12 = arith.constant dense<0.000000e+00> : vector<4x8x8xf32>
    %58 = tpu.matmul %57, %42, %cst_12 {dimension_numbers = #tpu.dot_dimension_numbers<[2], [1], [1], [2], [0, 0, 0, 1, 1, 2], [0], [0]>} : vector<4x8x8xbf16>, vector<4x8x8xbf16>, vector<4x8x8xf32> -> vector<4x8x8xf32>
    "tpu.trace_stop"() : () -> ()
    %59 = arith.truncf %58 : vector<4x8x8xf32> to vector<4x8x8xbf16>
    %c0_13 = arith.constant 0 : index
    %c0_14 = arith.constant 0 : index
    %c0_15 = arith.constant 0 : index
    %60 = vector.load %arg5[%c0_13, %c0_14, %c0_15] : memref<4x8x32xbf16, #tpu.memory_space<vmem>>, vector<4x8x32xbf16>
    "tpu.trace_start"() <{level = 10 : i32, message = "hqd,hdo->hqo"}> : () -> ()
    %cst_16 = arith.constant dense<0.000000e+00> : vector<4x8x32xf32>
    %61 = tpu.matmul %59, %60, %cst_16 {dimension_numbers = #tpu.dot_dimension_numbers<[2], [1], [1], [2], [0, 0, 0, 1, 1, 2], [0], [0]>} : vector<4x8x8xbf16>, vector<4x8x32xbf16>, vector<4x8x32xf32> -> vector<4x8x32xf32>
    "tpu.trace_stop"() : () -> ()
    %cst_17 = arith.constant dense<0.000000e+00> : vector<8x32xf32>
    %62 = vector.multi_reduction <add>, %61, %cst_17 [0] : vector<4x8x32xf32> to vector<8x32xf32>
    %c0_18 = arith.constant 0 : index
    %c0_19 = arith.constant 0 : index
    %63 = vector.load %arg6[%c0_18, %c0_19] : memref<1x32xf32, #tpu.memory_space<vmem>>, vector<1x32xf32>
    %64 = vector.broadcast %63 : vector<1x32xf32> to vector<8x32xf32>
    %65 = arith.addf %62, %64 : vector<8x32xf32>
    %66 = arith.addf %65, %1 : vector<8x32xf32>
    %cst_20 = arith.constant dense<0.000000e+00> : vector<8xf32>
    %67 = vector.multi_reduction <add>, %66, %cst_20 [1] : vector<8x32xf32> to vector<8xf32>
    %68 = vector.shape_cast %67 : vector<8xf32> to vector<8x1xf32>
    %cst_21 = arith.constant 3.125000e-02 : f32
    %69 = vector.broadcast %cst_21 : f32 to vector<8x1xf32>
    %70 = arith.mulf %68, %69 : vector<8x1xf32>
    %71 = vector.broadcast %70 : vector<8x1xf32> to vector<8x32xf32>
    %72 = arith.subf %66, %71 : vector<8x32xf32>
    %73 = arith.mulf %72, %72 : vector<8x32xf32>
    %cst_22 = arith.constant dense<0.000000e+00> : vector<8xf32>
    %74 = vector.multi_reduction <add>, %73, %cst_22 [1] : vector<8x32xf32> to vector<8xf32>
    %75 = vector.shape_cast %74 : vector<8xf32> to vector<8x1xf32>
    %cst_23 = arith.constant 3.125000e-02 : f32
    %76 = vector.broadcast %cst_23 : f32 to vector<8x1xf32>
    %77 = arith.mulf %75, %76 : vector<8x1xf32>
    %cst_24 = arith.constant 9.99999996E-13 : f32
    %78 = vector.broadcast %cst_24 : f32 to vector<8x1xf32>
    %79 = arith.addf %77, %78 : vector<8x1xf32>
    %80 = math.rsqrt %79 : vector<8x1xf32>
    %81 = vector.broadcast %80 : vector<8x1xf32> to vector<8x32xf32>
    %82 = arith.mulf %72, %81 : vector<8x32xf32>
    %c0_25 = arith.constant 0 : index
    %c0_26 = arith.constant 0 : index
    %83 = vector.load %arg7[%c0_25, %c0_26] : memref<1x32xf32, #tpu.memory_space<vmem>>, vector<1x32xf32>
    %84 = vector.broadcast %83 : vector<1x32xf32> to vector<8x32xf32>
    %85 = arith.mulf %82, %84 : vector<8x32xf32>
    %c0_27 = arith.constant 0 : index
    %c0_28 = arith.constant 0 : index
    %86 = vector.load %arg8[%c0_27, %c0_28] : memref<1x32xf32, #tpu.memory_space<vmem>>, vector<1x32xf32>
    %87 = vector.broadcast %86 : vector<1x32xf32> to vector<8x32xf32>
    %88 = arith.addf %85, %87 : vector<8x32xf32>
    %89 = vector.shape_cast %88 : vector<8x32xf32> to vector<1x8x32xf32>
    %c0_29 = arith.constant 0 : index
    %c0_30 = arith.constant 0 : index
    %c0_31 = arith.constant 0 : index
    %90 = vector.load %arg9[%c0_29, %c0_30, %c0_31] : memref<1x8x32xf32, #tpu.memory_space<vmem>>, vector<1x8x32xf32>
    tpu.vector_store %arg9[%c0_29, %c0_30, %c0_31], %89 {strides = array<i32>} : memref<1x8x32xf32, #tpu.memory_space<vmem>>, vector<1x8x32xf32>,
    return
  }
  func.func @transform_0(%arg0: i32) -> (i32, i32, i32) {
    %c0_i32 = arith.constant 0 : i32
    %c0_i32_0 = arith.constant 0 : i32
    %c0_i32_1 = arith.constant 0 : i32
    return %arg0, %c0_i32, %c0_i32_0 : i32, i32, i32
  }
  func.func @transform_1(%arg0: i32) -> (i32, i32, i32) {
    %c0_i32 = arith.constant 0 : i32
    %c0_i32_0 = arith.constant 0 : i32
    %c0_i32_1 = arith.constant 0 : i32
    return %arg0, %c0_i32, %c0_i32_0 : i32, i32, i32
  }
  func.func @transform_2(%arg0: i32) -> (i32, i32) {
    %c0_i32 = arith.constant 0 : i32
    %c0_i32_0 = arith.constant 0 : i32
    %c0_i32_1 = arith.constant 0 : i32
    return %c0_i32, %c0_i32_0 : i32, i32
  }
  func.func @transform_3(%arg0: i32) -> (i32, i32) {
    %c0_i32 = arith.constant 0 : i32
    %c0_i32_0 = arith.constant 0 : i32
    %c0_i32_1 = arith.constant 0 : i32
    return %c0_i32, %c0_i32_0 : i32, i32
  }
  func.func @transform_4(%arg0: i32) -> (i32, i32, i32) {
    %c0_i32 = arith.constant 0 : i32
    %c0_i32_0 = arith.constant 0 : i32
    %c0_i32_1 = arith.constant 0 : i32
    %c0_i32_2 = arith.constant 0 : i32
    return %c0_i32, %c0_i32_0, %c0_i32_1 : i32, i32, i32
  }
  func.func @transform_5(%arg0: i32) -> (i32, i32) {
    %c0_i32 = arith.constant 0 : i32
    %c0_i32_0 = arith.constant 0 : i32
    %c0_i32_1 = arith.constant 0 : i32
    return %c0_i32, %c0_i32_0 : i32, i32
  }
  func.func @transform_6(%arg0: i32) -> (i32, i32) {
    %c0_i32 = arith.constant 0 : i32
    %c0_i32_0 = arith.constant 0 : i32
    %c0_i32_1 = arith.constant 0 : i32
    return %c0_i32, %c0_i32_0 : i32, i32
  }
  func.func @transform_7(%arg0: i32) -> (i32, i32) {
    %c0_i32 = arith.constant 0 : i32
    %c0_i32_0 = arith.constant 0 : i32
    %c0_i32_1 = arith.constant 0 : i32
    return %c0_i32, %c0_i32_0 : i32, i32
  }
  func.func @transform_8(%arg0: i32) -> (i32, i32, i32) {
    %c0_i32 = arith.constant 0 : i32
    %c0_i32_0 = arith.constant 0 : i32
    %c0_i32_1 = arith.constant 0 : i32
    return %arg0, %c0_i32, %c0_i32_0 : i32, i32, i32
  }
}

</mosaic_0001>

<bundles_post_ra>
// kernel: tpu_custom_call.1
= control target key start
LH: loop header
LB: loop body
LE: loop exit
PB: predicated region body
PF: predicated region fallthrough
CT: control target
= control target key end

     0   :  { %s1582_s0 = inlined_call_operand.hbm [shape: f32[2,8,32], index: 0, kind: input, shape index: {}]   ;;  %s1583_s1 = inlined_call_operand.hbm [shape: f32[2,1,8], index: 1, kind: input, shape index: {}]   ;;  %s1584_s2 = inlined_call_operand.hbm [shape: bf16[32,96], index: 2, kind: input, shape index: {}]   ;;  %s1585_s3 = inlined_call_operand.vmem [shape: f32[1,96], index: 3, kind: input, shape index: {}]   ;;  %s1586_s4 = inlined_call_operand.hbm [shape: bf16[4,8,32], index: 4, kind: input, shape index: {}]   ;;  %s1587_s5 = inlined_call_operand.vmem [shape: f32[1,32], index: 5, kind: input, shape index: {}]   ;;  %s1588_s6 = inlined_call_operand.vmem [shape: f32[1,32], index: 6, kind: input, shape index: {}]   ;;  %s1589_s7 = inlined_call_operand.vmem [shape: f32[1,32], index: 7, kind: input, shape index: {}]   ;;  %s1590_s8 = inlined_call_operand.hbm [shape: f32[2,8,32], index: 8, kind: output, shape index: {}]  }
   0x1   :  { %1595 = sst [smem:[#allocation20_spill]] %s1584_s2 }
   0x2   :  { %1596 = sst [smem:[#allocation21_spill]] %s1586_s4 }
   0x3   :  { %13 = vsyncpa [#allocation3], 0 }
   0x4   :  { %15 = vsyncpa [#allocation3 + $0x1], 0 }
   0x5   :  { %16 = vsyncpa [#allocation6], 0 }
   0x6   :  { %18 = vsyncpa [#allocation6 + $0x1], 0 }
   0x7   :  { %19 = vsyncpa [#allocation9], 0 }
   0x8   :  { %20 = vsyncpa [#allocation4], 0 }
   0x9   :  { %22 = vsyncpa [#allocation4 + $0x1], 0  ;;  %s1328_s27 = smov 0   ;;  %s1330_s28 = smov 0  }
   0xa   :  { %s1332_s29 = smov 0   ;;  %s1334_s30 = smov 0  }
   0xb LB: > { %1597 = sst [smem:[#allocation16_spill]] %s1268_s29  ;;  %s1352_s12 = sadd.s32 4294967295, %s1272_s30   ;;  %s1272_s30 = sphi %s1334_s30, %s1611_s30   ;;  %s1268_s29 = sphi %s1332_s29, %s1613_s29   ;;  %s1264_s28 = sphi %s1330_s28, %s1615_s28   ;;  %s1260_s27 = sphi %s1328_s27, %s1614_s27  }
   0xc   : > { %s1598_s2 = sld [smem:[#allocation20_spill]]  ;;  %p934_p0 = scmp.ge.s32.totalorder %s1272_s30, 1 }
   0xd   : > { %p49_p1 = scmp.eq.s32.totalorder %s1352_s12, 0  ;;  %p237_p2 = scmp.lt.s32.totalorder %s1272_s30, 3 }
   0xe   : > { %s1274_s14 = smov [#allocation7]   ;;  %s1600_s4 = sld [smem:[#allocation21_spill]] }
   0xf   : > { %p1357_p3 = pnand %p934_p0, %p237_p2  ;;  %s250_s15 = sshll.u32 %s1274_s14, 4  ;;  %s251_s15 = int_to_ptr.vmem [resolvable:$true] %s250_s15 }
  0x10   : > { %s1275_s19 = smov [#allocation8]   ;;  %s1276_s21 = smov 64  }
  0x11   : > { %p986_p4 = pneg %p1357_p3  ;;  %s267_s20 = sshll.u32 %s1275_s19, 4  ;;  %s268_s20 = int_to_ptr.vmem [resolvable:$true] %s267_s20 }
  0x12   : > { %s248_s11 = sshll.u32 %s1598_s2, 4  ;;  %s1277_s22 = smov 4   ;;  %s249_s11 = int_to_ptr.hbm [resolvable:$true] %s248_s11 }
  0x13   : > { %p987_p6 = pnand %p986_p4, %p49_p1  ;;  %s933_s23 = sadd.s32 4294967294, %s1272_s30  }
  0x14   : > { %s265_s18 = sshll.u32 %s1600_s4, 4  ;;  %s1371_s24 = sadd.s32 1, %s1272_s30   ;;  %s266_s18 = int_to_ptr.hbm [resolvable:$true] %s265_s18 }
  0x15   : > { %989 = dma.hbm_to_vmem [thread:$0]  (!%p987_p6), %s249_s11, 256, %s251_s15, [#allocation6], %s1276_s21, %s1276_s21, %s1277_s22  }
  0x16   : > { %992 = dma.hbm_to_vmem [thread:$0]  (!%p987_p6), %s266_s18, 256, %s268_s20, [#allocation9], %s1276_s21, %s1276_s21, %s1277_s22  }
  0x17   : > { %1601 = sst [smem:[#allocation17_spill]] %s1371_s24  ;;  %s32_s25 = ssub.s32 %s1272_s30, %s1371_s24 }
  0x18   : > { %s35_s26 = sadd.s32 1, %s1268_s29  ;;  %p33_p7 = scmp.eq.s32.totalorder %s32_s25, 0 }
  0x19   : > { %p42_p8 = scmp.ne.s32.totalorder %s1268_s29, %s1264_s28  ;;  %p43_p9 = scmp.eq.s32.totalorder %s1272_s30, 0 }
  0x1a   : > { %p48_p10 = scmp.ne.s32.totalorder %s1264_s28, %s1260_s27  ;;  %p224_p13 = scmp.eq.s32.totalorder %s1352_s12, 1 }
  0x1b   : > { %s1382_s9 = scalar_select %p33_p7, %s1268_s29, %s35_s26  }
  0x1c   : > { %p1384_p11 = por %p43_p9, %p42_p8  ;;  %p1390_p12 = por %p49_p1, %p48_p10 }
  0x1d   : > { %1602 = sst [smem:[#allocation18_spill]] %s1382_s9  ;;  %p230_p0 = scmp.eq.s32.totalorder %s933_s23, 1 }
  0x1e   : > { %p1006_p2 = scmp.lt.s32.totalorder %s1272_s30, 2  ;;  %s1397_s14 = sand.u32 1, %s1268_s29  }
  0x1f   : > { %p1399_p4 = por %p224_p13, %p42_p8  ;;  %p1403_p6 = por %p230_p0, %p48_p10 }
  0x20   : > { %s938_s17 = sshll.u32 %s1397_s14, 3  ;;  %s939_s18 = sshll.u32 %s1272_s30, 3 }
  0x21   : > { %s1606_s16 = scalar_select %p1403_p6, 1, 0 }
  0x22   : > { %s298_s21 = scalar_lea.hbm %s1582_s0, %s939_s18  ;;  %s294_s22 = scalar_lea.vmem [#allocation2], %s938_s17 }
  0x23   : > { %1607 = sst [smem:[#allocation19_spill]] %s1606_s16  ;;  %s302_s23 = sshll.u32 %s294_s22, 4  ;;  %s303_s23 = int_to_ptr.vmem [resolvable:$true] %s302_s23 }
  0x24   : > { %s300_s25 = sshll.u32 %s298_s21, 4  ;;  %p1414_p7 = pnand %p1006_p2, %p1384_p11  ;;  %s301_s25 = int_to_ptr.hbm [resolvable:$true] %s300_s25 }
  0x25   : > { %s309_s2 = sand.u32 1, %s1272_s30   ;;  %s291_s4 = scalar_lea.sflag [#allocation3], %s1397_s14 }
  0x26   : > { %s1134_s9 = sshra.s32 %s301_s25, 4  ;;  %p1138_p9 = pneg %p1414_p7  ;;  %s1135_s9 = int_to_ptr.hbm [resolvable:$true] %s1134_s9 }
  0x27   : > { %s1136_s29 = scalar_lea.hbm %s1135_s9, 8  ;;  %s1141_s18 = scalar_lea.hbm %s1582_s0, 16 }
  0x28   : > { %p1137_p8 = scmp.ne.s32.totalorder %s1135_s9, %s1136_s29  ;;  %p1142_p11 = scmp.lt.s32.totalorder %s1135_s9, %s1582_s0 }
  0x29   : > { %p1143_p0 = scmp.lt.s32.totalorder %s1141_s18, %s1136_s29 }
  0x2a   : > { %p1139_p10 = pnand %p1138_p9, %p1137_p8 }
  0x2b   : > { %p1144_p2 = por %p1143_p0, %p1142_p11 }
  0x2c   : > { %p1140_p13 = pneg %p1139_p10 }
  0x2e   : > { %p1145_p5 = pnand %p1144_p2, %p1140_p13 }
  0x30   : > { %1148 = shalt.err (!%p1145_p5)
}
  0x31   : > { %996 = dma.hbm_to_vmem [thread:$0]  (!%p1414_p7), %s301_s25, 128, %s303_s23, %s291_s4  }
  0x32   : > { %s315_s24 = scalar_lea.hbm %s1583_s1, %s1272_s30  ;;  %s312_s17 = scalar_lea.vmem [#allocation5], %s1397_s14 }
  0x33   : > { %s319_s10 = sshll.u32 %s312_s17, 4  ;;  %s317_s16 = sshll.u32 %s315_s24, 4  ;;  %s320_s10 = int_to_ptr.vmem [resolvable:$true] %s319_s10  ;;  %s318_s16 = int_to_ptr.hbm [resolvable:$true] %s317_s16 }
  0x34   : > { %s310_s9 = scalar_lea.sflag [#allocation6], %s309_s2  ;;  %s1164_s29 = sshra.s32 %s318_s16, 4  ;;  %s1165_s29 = int_to_ptr.hbm [resolvable:$true] %s1164_s29 }
  0x35   : > { %s1166_s18 = scalar_lea.hbm %s1165_s29, 1  ;;  %s1171_s23 = scalar_lea.hbm %s1583_s1, 2 }
  0x36   : > { %p1167_p5 = scmp.ne.s32.totalorder %s1165_s29, %s1166_s18  ;;  %p1172_p13 = scmp.lt.s32.totalorder %s1165_s29, %s1583_s1 }
  0x37   : > { %p1173_p11 = scmp.lt.s32.totalorder %s1171_s23, %s1166_s18 }
  0x38   : > { %p1169_p8 = pnand %p1167_p5, %p1138_p9 }
  0x39   : > { %p1174_p0 = por %p1173_p11, %p1172_p13 }
  0x3a   : > { %p1170_p10 = pneg %p1169_p8 }
  0x3c   : > { %p1175_p2 = pnand %p1174_p0, %p1170_p10 }
  0x3e   : > { %1178 = shalt.err (!%p1175_p2)
}
  0x3f   : > { %999 = dma.hbm_to_vmem [thread:$0]  (!%p1414_p7), %s318_s16, 16, %s320_s10, %s310_s9  }
  0x40   : > { %328 = sbr.rel (%p1357_p3) target bundleno = 1410 (0x582), region = 52  ;;  %s1452_s2 = sand.u32 (!%p1357_p3), 1, %s1264_s28  }
  0x41   : > { %s941_s24 = sshll.u32 (!%p1357_p3), %s1452_s2, 3  ;;  %s331_s14 = scalar_lea.sflag (!%p1357_p3), [#allocation3], %s1452_s2 }
  0x42   : > { %s334_s21 = scalar_lea.vmem (!%p1357_p3), [#allocation2], %s941_s24 }
  0x45   : > { %1239 = dma.done.wait (%p1390_p12), %s331_s14, 128  }
  0x46   : > { %1241 = vsyncadd (%p1390_p12), %s331_s14, 4294967168  ;;  %s340_s13 = sand.u32 1, %s1352_s12   ;;  %s343_s26 = scalar_lea.vmem [#allocation5], %s1452_s2 }
  0x47   : > { %s341_s16 = scalar_lea.sflag [#allocation6], %s340_s13 }
  0x48   : > { %1243 = dma.done.wait (%p1390_p12), %s341_s16, 16  }
  0x49   : > { %1245 = vsyncadd (%p1390_p12), %s341_s16, 4294967280 }
  0x4a   : > { %1247 = dma.done.wait (%p49_p1), [#allocation6], 256  }
  0x4b   : > { %1249 = vsyncadd (%p49_p1), [#allocation6], 4294967040 }
  0x4c   : > { %1251 = dma.done.wait (%p49_p1), [#allocation9], 256  }
  0x4d   : > { %1253 = vsyncadd (%p49_p1), [#allocation9], 4294967040  ;;  %v971_v0 = vld [vmem:[#allocation7 + $0x8] sm:$0xff]  ;;  %v970_v1 = vld [vmem:[#allocation7] sm:$0xff]  ;;  %vm415_vm0 = vcmask 261120   ;;  %s1278_s17 = smov 104  }
  0x4e   : > { %v1476_v2 = vld [vmem:[%s334_s21] sm:$0xff]  ;;  %425 = vmatpush.bf16.msra.mxu0 %v971_v0  ;;  %s1279_s10 = smov 120   ;;  %s1280_s9 = smov 112   ;;  %vm454_vm1 = vcmask 64512   ;;  %vm599_vm2 = vcmask 1043456  }
  0x4f   : > { %v394_v3 = vpack.c.bf16 %v1476_v2, %v1476_v2  ;;  %v1051_v4 = vld [vmem:[%s1585_s3] ss:$0 sm:$0xff]  ;;  %s1281_s29 = smov 96   ;;  %s1282_s18 = smov 64  }
  0x50   : > { %v1052_v31 = vld [vmem:[%s343_s26] ss:$0 sm:$0xff]  ;;  %s967_s23 = sshll.u32 %s1352_s12, 3  ;;  %s390_s12 = scalar_lea.vmem [#allocation10], %s941_s24 }
  0x51   : > { %s820_s13 = scalar_lea.hbm %s1590_s8, %s967_s23  ;;  %s822_s11 = sshll.u32 %s390_s12, 4  ;;  %s823_s11 = int_to_ptr.vmem [resolvable:$true] %s822_s11 }
  0x52   : > { %426 = vmatpush.bf16.msra.mxu0 %v970_v1  ;;  %s824_s22 = sshll.u32 %s820_s13, 4  ;;  %s1214_s24 = scalar_lea.hbm %s1590_s8, 16  ;;  %s825_s22 = int_to_ptr.hbm [resolvable:$true] %s824_s22 }
  0x55   : > { %953 = vmatmul.msk.bf16.vlgmr.msra.gmra.mxu0 %vm415_vm0, %v394_v3 }
  0xd2   : > { %v428_v5 = vpop.f32.mrf.mxu0 }
  0xd3   : > { %v429_v6 = vadd.f32 %v1051_v4, %v428_v5 }
  0xd5   : > { %439 = vrot.lane.b32.xlu1 %v429_v6, %s1278_s17  ;;  %433 = vrot.lane.b32.xlu0 %v429_v6, %s1279_s10  ;;  %v442_v20 = vpack.c.bf16 %v429_v6, %v429_v6  ;;  %s810_s17 = scalar_lea.sflag [#allocation4], %s1452_s2  ;;  %s1208_s10 = sshra.s32 %s825_s22, 4  ;;  %s1209_s10 = int_to_ptr.hbm [resolvable:$true] %s1208_s10 }
  0xd6   : > { %p1215_p7 = scmp.lt.s32.totalorder %s1209_s10, %s1590_s8 }
  0xd7   : > { %v450_v21 = vunpack.c.l.b16 %v442_v20 }
  0xd9   : > { %v451_v22 = vpack.c.b16 %v450_v21, %v450_v21 }
  0xda   : > { %v430_v7 = vpop.f32.mrf.mxu0 }
  0xdd   : > { %436 = vrot.lane.b32.xlu0 %v429_v6, %s1280_s9  ;;  %s1210_s9 = scalar_lea.hbm %s1209_s10, 8 }
  0xde   : > { %p1211_p1 = scmp.ne.s32.totalorder %s1209_s10, %s1210_s9  ;;  %p1216_p9 = scmp.lt.s32.totalorder %s1214_s24, %s1210_s9 }
  0xe0   : > { %p1212_p3 = pnand %p1211_p1, %p1399_p4  ;;  %p1217_p5 = por %p1216_p9, %p1215_p7 }
  0xe2   : > { %p1213_p12 = pneg %p1212_p3 }
  0xe4   : > { %p1218_p8 = pnand %p1217_p5, %p1213_p12 }
 0x147   : > { %v440_v8 = vpop.permute.xlu1 %439  ;;  %v434_v9 = vpop.permute.xlu0 %433 }
 0x148   : > { %v445_v10 = vpack.c.bf16 %v440_v8, %v440_v8  ;;  %v443_v11 = vpack.c.bf16 %v434_v9, %v434_v9 }
 0x14a   : > { %v523_v12 = vunpack.c.l.b16 %v445_v10  ;;  %v475_v13 = vunpack.c.l.b16 %v443_v11 }
 0x14c   : > { %v1484_v14 = vpack.c.b16 %v523_v12, %v523_v12  ;;  %v476_v15 = vpack.c.b16 %v475_v13, %v475_v13 }
 0x14e   : > { %525 = vrot.lane.b32.xlu0 %v1484_v14, %s1281_s29  ;;  %477 = vrot.lane.b32.xlu1 %v476_v15, %s1281_s29 }
 0x14f   : > { %v437_v16 = vpop.permute.xlu0 %436 }
 0x150   : > { %v444_v17 = vpack.c.bf16 %v437_v16, %v437_v16 }
 0x152   : > { %v499_v18 = vunpack.c.l.b16 %v444_v17 }
 0x154   : > { %v1487_v19 = vpack.c.b16 %v499_v18, %v499_v18 }
 0x156   : > { %501 = vrot.lane.b32.xlu2 %v1487_v19, %s1281_s29 }
 0x15e   : > { %452 = vrot.lane.b32.xlu2 %v451_v22, %s1281_s29 }
 0x1b0   : > { %v502_v23 = vpop.permute.xlu2 %501 }
 0x1b1   : > { %v507_v24 = vsel %vm454_vm1, %v502_v23, 0 }
 0x1b2   : > { %516 = vmatpush.bf16.xpose.msra.mxu3 %v507_v24 }
 0x1b8   : > { %v453_v25 = vpop.permute.xlu2 %452 }
 0x1b9   : > { %956 = vmatmul.msk.bf16.vlgmr.msra.gmra.mxu3 %vm454_vm1, %v444_v17  ;;  %v459_v26 = vsel %vm454_vm1, %v453_v25, 0 }
 0x1ba   : > { %468 = vmatpush.bf16.xpose.msra.mxu1 %v459_v26 }
 0x1c0   : > { %v478_v27 = vpop.permute.xlu1 %477  ;;  %v526_v28 = vpop.permute.xlu0 %525 }
 0x1c1   : > { %954 = vmatmul.msk.bf16.vlgmr.msra.gmra.mxu1 %vm454_vm1, %v442_v20  ;;  %v483_v29 = vsel %vm454_vm1, %v478_v27, 0  ;;  %v531_v30 = vsel %vm454_vm1, %v526_v28, 0 }
 0x1c2   : > { %492 = vmatpush.bf16.xpose.msra.mxu2 %v483_v29  ;;  %540 = vmatpush.bf16.xpose.msrb.mxu0 %v531_v30  ;;  %v683_v29 = vld [vmem:[#allocation8] sm:$0xf] }
 0x1c3   : > { %v691_v30 = vsel %vm599_vm2, %v683_v29, 0 }
 0x1c9   : > { %955 = vmatmul.msk.bf16.vlgmr.msra.gmra.mxu2 %vm454_vm1, %v443_v11  ;;  %957 = vmatmul.msk.bf16.vlgmr.msrb.gmra.mxu0 %vm454_vm1, %v445_v10 }
 0x23c   : > { %v518_v32 = vpop.f32.mrf.mxu3 }
 0x23d   : > { %v519_v33 = vadd.f32 %v1052_v31, %v518_v32 }
 0x23e   : > { %v470_v34 = vpop.f32.mrf.mxu1 }
 0x23f   : > { %v471_v35 = vadd.f32 %v1052_v31, %v470_v34  ;;  %v552_v36 = vsel %vm454_vm1, %v519_v33, -inf }
 0x240   : > { %553 = vmax.xlane.f32.xlu2 %v552_v36 }
 0x241   : > { %v546_v37 = vsel %vm454_vm1, %v471_v35, -inf }
 0x242   : > { %547 = vmax.xlane.f32.xlu0 %v546_v37  ;;  %v685_v37 = vld [vmem:[#allocation8 + $0x8] sm:$0xf] }
 0x244   : > { %v520_v38 = vpop.f32.mrf.mxu3 }
 0x245   : > { %v729_v38 = vsel %vm599_vm2, %v685_v37, 0 }
 0x246   : > { %v472_v39 = vpop.f32.mrf.mxu1  ;;  %v542_v40 = vpop.f32.mrf.mxu0 }
 0x247   : > { %v543_v41 = vadd.f32 %v1052_v31, %v542_v40 }
 0x249   : > { %v555_v42 = vsel %vm454_vm1, %v543_v41, -inf }
 0x24a   : > { %556 = vmax.xlane.f32.xlu2 %v555_v42 }
 0x24c   : > { %v494_v43 = vpop.f32.mrf.mxu2 }
 0x24d   : > { %v495_v44 = vadd.f32 %v1052_v31, %v494_v43  ;;  %v686_v31 = vld [vmem:[#allocation8 + $0xc] sm:$0xf] }
 0x24e   : > { %v544_v45 = vpop.f32.mrf.mxu0  ;;  %v748_v32 = vsel %vm599_vm2, %v686_v31, 0 }
 0x24f   : > { %v549_v46 = vsel %vm454_vm1, %v495_v44, -inf }
 0x250   : > { %550 = vmax.xlane.f32.xlu1 %v549_v46 }
 0x254   : > { %v496_v47 = vpop.f32.mrf.mxu2 }
 0x256   : > { %616 = vrot.lane.b32.xlu0 %v476_v15, %s1282_s18 }
 0x25e   : > { %594 = vrot.lane.b32.xlu0 %v451_v22, %s1282_s18 }
 0x2b3   : > { %v554_v48 = vpop.xlane.xlu2 %553 }
 0x2b4   : > { %v560_v54 = vsub.f32 %v519_v33, %v554_v48  ;;  %v684_v33 = vld [vmem:[#allocation8 + $0x4] sm:$0xf] }
 0x2b5   : > { %v548_v49 = vpop.xlane.xlu0 %547  ;;  %v710_v34 = vsel %vm599_vm2, %v684_v33, 0 }
 0x2b6   : > { %v558_v50 = vsub.f32 %v471_v35, %v548_v49  ;;  %v566_v58 = vmul.f32 1.442695, %v560_v54 }
 0x2b8   : > { %v562_v51 = vmul.f32 1.442695, %v558_v50 }
 0x2ba   : > { %1056 = vpow2.f32 %v562_v51 }
 0x2bd   : > { %v557_v52 = vpop.xlane.xlu2 %556 }
 0x2be   : > { %v561_v53 = vsub.f32 %v543_v41, %v557_v52 }
 0x2c0   : > { %v1057_v55 = vpop.eup %1056  ;;  %v568_v56 = vmul.f32 1.442695, %v561_v53 }
 0x2c1   : > { %v570_v57 = vsel %vm454_vm1, %v1057_v55, 0.0 }
 0x2c2   : > { %1058 = vpow2.f32 %v568_v56  ;;  %571 = vadd.xlane.f32.xlu2 %v570_v57 }
 0x2c3   : > { %v551_v59 = vpop.xlane.xlu1 %550  ;;  %1060 = vpow2.f32 %v566_v58 }
 0x2c4   : > { %v559_v60 = vsub.f32 %v495_v44, %v551_v59 }
 0x2c6   : > { %v564_v61 = vmul.f32 1.442695, %v559_v60 }
 0x2c8   : > { %v1059_v62 = vpop.eup %1058  ;;  %1062 = vpow2.f32 %v564_v61  ;;  %v617_v63 = vpop.permute.xlu0 %616  ;;  %v1053_v61 = vld [vmem:[%s1587_s5] ss:$0 sm:$0xff] }
 0x2c9   : > { %v622_v0 = vsel %vm599_vm2, %v617_v63, 0  ;;  %v579_v1 = vsel %vm454_vm1, %v1059_v62, 0.0  ;;  %v1061_v3 = vpop.eup %1060 }
 0x2ca   : > { %631 = vmatpush.bf16.msrb.mxu2 %v622_v0  ;;  %580 = vadd.xlane.f32.xlu2 %v579_v1  ;;  %v576_v8 = vsel %vm454_vm1, %v1061_v3, 0.0 }
 0x2ce   : > { %v1063_v4 = vpop.eup %1062  ;;  %719 = vmatpush.bf16.msra.mxu2 %v710_v34 }
 0x2cf   : > { %v573_v5 = vsel %vm454_vm1, %v1063_v4, 0.0 }
 0x2d0   : > { %574 = vadd.xlane.f32.xlu1 %v573_v5  ;;  %v595_v6 = vpop.permute.xlu0 %594 }
 0x2d1   : > { %v601_v7 = vsel %vm599_vm2, %v595_v6, 0 }
 0x2d2   : > { %610 = vmatpush.bf16.msrb.mxu1 %v601_v7  ;;  %577 = vadd.xlane.f32.xlu2 %v576_v8 }
 0x2d6   : > { %700 = vmatpush.bf16.msra.mxu1 %v691_v30 }
 0x2e9   : > { %637 = vrot.lane.b32.xlu1 %v1487_v19, %s1282_s18 }
 0x2ea   : > { %658 = vrot.lane.b32.xlu2 %v1484_v14, %s1282_s18 }
 0x335   : > { %v572_v9 = vpop.xlane.xlu2 %571 }
 0x336   : > { %1064 = vrcp.f32 %v572_v9 }
 0x33c   : > { %v1065_v10 = vpop.eup %1064 }
 0x33d   : > { %v586_v11 = vmul.f32 %v1065_v10, %v1057_v55  ;;  %v581_v12 = vpop.xlane.xlu2 %580 }
 0x33e   : > { %1066 = vrcp.f32 %v581_v12 }
 0x33f   : > { %v590_v13 = vpack.c.bf16 %v586_v11, %v586_v11 }
 0x341   : > { %958 = vmatmul.msk.bf16.vlgmr.msrb.gmra.mxu1 %vm454_vm1, %v590_v13 }
 0x343   : > { %v575_v15 = vpop.xlane.xlu1 %574 }
 0x344   : > { %1068 = vrcp.f32 %v575_v15  ;;  %v1067_v17 = vpop.eup %1066 }
 0x345   : > { %v578_v16 = vpop.xlane.xlu2 %577  ;;  %v589_v21 = vmul.f32 %v1067_v17, %v1059_v62 }
 0x346   : > { %1070 = vrcp.f32 %v578_v16 }
 0x347   : > { %v593_v23 = vpack.c.bf16 %v589_v21, %v589_v21 }
 0x34a   : > { %v1069_v18 = vpop.eup %1068 }
 0x34b   : > { %v587_v20 = vmul.f32 %v1069_v18, %v1063_v4 }
 0x34c   : > { %v1071_v24 = vpop.eup %1070 }
 0x34d   : > { %v659_v19 = vpop.permute.xlu2 %658  ;;  %v591_v22 = vpack.c.bf16 %v587_v20, %v587_v20  ;;  %v588_v25 = vmul.f32 %v1071_v24, %v1061_v3  ;;  %v1054_v20 = vld [vmem:[%s1588_s6] ss:$0 sm:$0xff] }
 0x34e   : > { %v664_v14 = vsel %vm599_vm2, %v659_v19, 0  ;;  %v1055_v19 = vld [vmem:[%s1589_s7] ss:$0 sm:$0xff] }
 0x34f   : > { %959 = vmatmul.msk.bf16.vlgmr.msrb.gmra.mxu2 %vm454_vm1, %v591_v22  ;;  %673 = vmatpush.bf16.msra.mxu0 %v664_v14  ;;  %v592_v28 = vpack.c.bf16 %v588_v25, %v588_v25 }
 0x352   : > { %961 = vmatmul.msk.bf16.vlgmr.msra.gmra.mxu0 %vm454_vm1, %v593_v23 }
 0x353   : > { %757 = vmatpush.bf16.msrb.mxu0 %v748_v32 }
 0x35b   : > { %v638_v26 = vpop.permute.xlu1 %637 }
 0x35c   : > { %v643_v27 = vsel %vm599_vm2, %v638_v26, 0 }
 0x35d   : > { %652 = vmatpush.bf16.msrb.mxu3 %v643_v27 }
 0x360   : > { %960 = vmatmul.msk.bf16.vlgmr.msrb.gmra.mxu3 %vm454_vm1, %v592_v28 }
 0x361   : > { %738 = vmatpush.bf16.msra.mxu3 %v729_v38 }
 0x3be   : > { %v612_v35 = vpop.f32.mrf.mxu1 }
 0x3bf   : > { %v679_v36 = vpack.c.bf16 %v612_v35, %v612_v35 }
 0x3c1   : > { %962 = vmatmul.msk.bf16.vlgmr.msra.gmra.mxu1 %vm454_vm1, %v679_v36 }
 0x3c6   : > { %v614_v39 = vpop.f32.mrf.mxu1 }
 0x3cf   : > { %v675_v40 = vpop.f32.mrf.mxu0 }
 0x3d0   : > { %v682_v41 = vpack.c.bf16 %v675_v40, %v675_v40 }
 0x3d2   : > { %v633_v42 = vpop.f32.mrf.mxu2  ;;  %965 = vmatmul.msk.bf16.vlgmr.msrb.gmra.mxu0 %vm454_vm1, %v682_v41 }
 0x3d3   : > { %v680_v43 = vpack.c.bf16 %v633_v42, %v633_v42 }
 0x3d5   : > { %963 = vmatmul.msk.bf16.vlgmr.msra.gmra.mxu2 %vm454_vm1, %v680_v43 }
 0x3d7   : > { %v677_v44 = vpop.f32.mrf.mxu0 }
 0x3da   : > { %v635_v45 = vpop.f32.mrf.mxu2 }
 0x3e3   : > { %v654_v46 = vpop.f32.mrf.mxu3 }
 0x3e4   : > { %v681_v47 = vpack.c.bf16 %v654_v46, %v654_v46 }
 0x3e6   : > { %964 = vmatmul.msk.bf16.vlgmr.msra.gmra.mxu3 %vm454_vm1, %v681_v47 }
 0x3eb   : > { %v656_v48 = vpop.f32.mrf.mxu3 }
 0x43e   : > { %v702_v49 = vpop.f32.mrf.mxu1 }
 0x43f   : > { %v763_v56 = vsel %vm415_vm0, %v702_v49, 0.0 }
 0x446   : > { %v704_v50 = vpop.f32.mrf.mxu1 }
 0x44f   : > { %v759_v51 = vpop.f32.mrf.mxu0 }
 0x450   : > { %v768_v62 = vsel %vm415_vm0, %v759_v51, 0.0 }
 0x457   : > { %v761_v52 = vpop.f32.mrf.mxu0 }
 0x458   : > { %v721_v53 = vpop.f32.mrf.mxu2 }
 0x459   : > { %v764_v55 = vsel %vm415_vm0, %v721_v53, 0.0 }
 0x45a   : > { %v765_v57 = vadd.f32 %v764_v55, %v763_v56 }
 0x460   : > { %v723_v54 = vpop.f32.mrf.mxu2 }
 0x469   : > { %v740_v58 = vpop.f32.mrf.mxu3 }
 0x46a   : > { %v766_v59 = vsel %vm415_vm0, %v740_v58, 0.0 }
 0x46b   : > { %v767_v60 = vadd.f32 %v766_v59, %v765_v57 }
 0x46d   : > { %v769_v63 = vadd.f32 %v768_v62, %v767_v60 }
 0x46f   : > { %v774_v0 = vadd.f32 %v1053_v61, %v769_v63 }
 0x471   : > { %v742_v1 = vpop.f32.mrf.mxu3  ;;  %v775_v3 = vadd.f32 %v774_v0, %v1476_v2 }
 0x473   : > { %v776_v4 = vsel %vm415_vm0, %v775_v3, 0.0 }
 0x474   : > { %777 = vadd.xlane.f32.xlu1 %v776_v4 }
 0x4e7   : > { %v778_v5 = vpop.xlane.xlu1 %777 }
 0x4e8   : > { %v779_v6 = vmul.f32 0.03125, %v778_v5 }
 0x4ea   : > { %v780_v7 = vsub.f32 %v775_v3, %v779_v6 }
 0x4ec   : > { %v781_v8 = vmul.f32 %v780_v7, %v780_v7 }
 0x4ee   : > { %v782_v9 = vsel %vm415_vm0, %v781_v8, 0.0 }
 0x4ef   : > { %783 = vadd.xlane.f32.xlu0 %v782_v9 }
 0x562   : > { %v784_v10 = vpop.xlane.xlu0 %783 }
 0x563   : > { %v785_v11 = vmul.f32 0.03125, %v784_v10 }
 0x565   : > { %v786_v12 = vadd.f32 1e-12, %v785_v11 }
 0x567   : > { %1072 = vrsqrt.f32 %v786_v12  ;;  %vm793_vm4 = vweird.f32 %v786_v12 }
 0x56d   : > { %v1073_v13 = vpop.eup %1072 }
 0x56e   : > { %v788_v15 = vmul.f32 %v1073_v13, %v786_v12  ;;  %vm794_vm3 = vweird.f32 %v1073_v13 }
 0x56f   : > { %vm795_vm5 = vmor %vm793_vm4, %vm794_vm3 }
 0x570   : > { %v789_v16 = vmul.f32 %v1073_v13, %v788_v15 }
 0x572   : > { %v790_v2 = vmul.f32 0.5, %v789_v16 }
 0x574   : > { %v791_v17 = vsub.f32 1.5, %v790_v2 }
 0x576   : > { %v792_v18 = vmul.f32 %v1073_v13, %v791_v17 }
 0x578   : > { %v796_v21 = vsel %vm795_vm5, %v1073_v13, %v792_v18 }
 0x579   : > { %v797_v22 = vmul.f32 %v796_v21, %v780_v7 }
 0x57b   : > { %v802_v14 = vmul.f32 %v1054_v20, %v797_v22 }
 0x57d   : > { %v807_v23 = vadd.f32 %v1055_v19, %v802_v14 }
 0x57f   : > { %808 = vst.msk [vmem:[%s390_s12] sm:$0xff] %vm415_vm0, %v807_v23 }
 0x580   : > { %1221 = shalt.err (!%p1218_p8)
}
 0x581   : > { %984 = dma.vmem_to_hbm [thread:$0]  (%p1399_p4), %s823_s11, 128, %s825_s22, %s810_s17  }
 0x582 PF: > { %s836_s23 = sand.u32 1, %s1260_s27   ;;  %p1610_p10 = scmp.ge.s32.totalorder %s1272_s30, 2 }
 0x583   : > { %s837_s25 = scalar_lea.sflag [#allocation4], %s836_s23 }
 0x584   : > { %p1001_p13 = pnand %p1610_p10, %p1403_p6 }
 0x586   : > { %p1002_p11 = pneg %p1001_p13 }
 0x588   : > { %1255 = dma.done.wait (%p1002_p11), %s837_s25, 128  }
 0x589   : > { %1257 = vsyncadd (%p1002_p11), %s837_s25, 4294967168  ;;  %s1611_s30 = sld [smem:[#allocation17_spill]]  ;;  %s1614_s27 = smov %s1264_s28 }
 0x58a   : > { %s1612_s20 = sld [smem:[#allocation16_spill]] }
 0x58b   : > { %s1613_s29 = sld [smem:[#allocation18_spill]] }
 0x58f   : > { %p25_p0 = scmp.ge.s32.totalorder %s1611_s30, 4  }
 0x590   : > { %s1615_s28 = smov %s1612_s20 }
 0x591   :  { %27 = sbr.rel (!%p25_p0) target bundleno = 11 (0xb), region = 118 }
 0x596   :  { %843 = vsyncpa [#allocation3], 1 }
 0x597   :  { %845 = vsyncpa [#allocation3 + $0x1], 1 }
 0x598   :  { %846 = vsyncpa [#allocation6], 1 }
 0x599   :  { %848 = vsyncpa [#allocation6 + $0x1], 1 }
 0x59a   :  { %849 = vsyncpa [#allocation9], 1 }
 0x59b   :  { %850 = vsyncpa [#allocation4], 1 }
 0x59c   :  { %852 = vsyncpa [#allocation4 + $0x1], 1 }

</bundles_post_ra>
